<compile_context>
chip_gen: v7x
topology: tpu7x:2x2x1
jax: 0.10.0
libtpu: 0.0.40
codegen_flags: <defaults>
</compile_context>

<pallas_src>
import jax
import jax.numpy as jnp
from jax import lax
from jax.experimental import pallas as pl
from jax.experimental.pallas import tpu as pltpu


def _general_attention_kernel(x_ref, wt_ref, b_ref, o_ref):
    x = x_ref[...]                                   # (TB, S, H)
    TB, S, H = x.shape

    # Linear: q = x @ W.T + b.  wt_ref already holds W.T, so this is a plain
    # 2-D MXU matmul with no in-kernel transpose.
    q = jnp.dot(x.reshape(TB * S, H), wt_ref[...],
                preferred_element_type=jnp.float32)
    q = (q + b_ref[...]).reshape(TB, S, H)           # (TB, S, H)

    # scores[b,i,j] = q[b,i,:] . x[b,j,:]  — batched, last-dim contraction on
    # both operands, no transposed copy of x.
    scores = jnp.einsum("bih,bjh->bij", q, x,
                        preferred_element_type=jnp.float32)   # (TB, S, S)

    # Strictly-lower-triangular mask (j < i) applied BEFORE exp: masked entries
    # become exp(-inf) == 0, identical to att * mask in the reference.
    row = lax.broadcasted_iota(jnp.int32, (TB, S, S), 1)
    col = lax.broadcasted_iota(jnp.int32, (TB, S, S), 2)
    att = jnp.exp(jnp.where(col < row, scores, -jnp.inf))     # (TB, S, S)

    # Deferred normalization: S reciprocals (EUP) instead of S*S divides, and
    # the scale is applied after the final matmul.  One Newton-Raphson step
    # restores ~full f32 accuracy at O(S) cost.
    denom = jnp.sum(att, axis=-1, keepdims=True) + 1e-10      # (TB, S, 1)
    inv = pl.reciprocal(denom, approx=True)
    inv = inv * (2.0 - denom * inv)

    out = jnp.einsum("bij,bjh->bih", att, x,
                     preferred_element_type=jnp.float32)      # (TB, S, H)
    o_ref[...] = (out * inv).astype(o_ref.dtype)


def _pick_batch_block(B, S, H, vmem_budget_bytes):
    """Largest divisor of B whose per-step working set fits the VMEM budget,
    stepping down once so there are >=2 grid steps when B > 1 (v7x megacore)."""
    def working_set(tb):
        xo = 2 * 2 * tb * S * H            # x + out blocks, double-buffered
        q_ = tb * S * H                    # q intermediate
        ss = 3 * tb * S * S                # scores / att / headroom
        wb = 2 * (H * H + H)               # weight + bias (double-buffered)
        return 4 * (xo + q_ + ss + wb)     # f32 bytes

    divisors = [d for d in range(B, 0, -1) if B % d == 0]
    tb = next((d for d in divisors if working_set(d) <= vmem_budget_bytes), 1)
    if tb == B and B > 1:
        tb = next((d for d in divisors
                   if d < B and working_set(d) <= vmem_budget_bytes), 1)
    return tb


def general_attention(input_data, weight, bias):
    """input_data: (B, S, H); weight: (H, H) nn.Linear-style; bias: (H,)."""
    B, S, H = input_data.shape
    weight_t = weight.T                     # pre-transpose once in the wrapper
    bias2d = bias.reshape(1, H)

    vmem_limit = 48 * 1024 * 1024           # safe on v5e/v6e (128 MiB) & v7x (64 MiB)
    tb = _pick_batch_block(B, S, H, vmem_budget_bytes=vmem_limit // 2)
    grid = (B // tb,)

    cost = pl.CostEstimate(
        flops=2 * B * (S * H * H + 2 * S * S * H),
        transcendentals=B * S * S + B * S,
        bytes_accessed=2 * B * S * H * 4 + H * H * 4 + H * 4,
    )

    return pl.pallas_call(
        _general_attention_kernel,
        out_shape=jax.ShapeDtypeStruct((B, S, H), jnp.float32),
        grid_spec=pltpu.PrefetchScalarGridSpec(
            num_scalar_prefetch=0,
            grid=grid,
            in_specs=[
                pl.BlockSpec((tb, S, H), lambda b: (b, 0, 0)),   # x, batch block
                pl.BlockSpec((H, H), lambda b: (0, 0)),          # W.T, replicated
                pl.BlockSpec((1, H), lambda b: (0, 0)),          # bias, replicated
            ],
            out_specs=pl.BlockSpec((tb, S, H), lambda b: (b, 0, 0)),
        ),
        compiler_params=pltpu.CompilerParams(
            dimension_semantics=("parallel",),
            vmem_limit_bytes=vmem_limit,
        ),
        cost_estimate=cost,
    )(input_data, weight_t, bias2d)


def general_attention_ref(x, w, b):
    """Pure-JAX reference mirroring the PyTorch forward exactly."""
    B, S, H = x.shape
    q = x @ w.T + b                                    # (B, S, H)
    att = jnp.exp(jnp.einsum("bih,bjh->bij", q, x))    # (B, S, S)
    mask = jnp.triu(jnp.ones((S, S)), k=1).T[None]     # (1, S, S) strict lower
    masked = att * mask
    denom = jnp.sum(masked, axis=-1, keepdims=True) + 1e-10
    wgt = masked / denom
    return jnp.einsum("bij,bjh->bih", wgt, x)


if __name__ == "__main__":
    B, S, H = 2, 8, 32

    key = jax.random.PRNGKey(0)
    kx, kw, kb = jax.random.split(key, 3)

    x = jax.random.normal(kx, (B, S, H), dtype=jnp.float32) * 0.1
    # Deterministic nn.Linear-style parameters (synthetic, not a checkpoint).
    bound = 1.0 / (H ** 0.5)
    weight = jax.random.uniform(kw, (H, H), jnp.float32, -bound, bound)
    bias = jax.random.uniform(kb, (H,), jnp.float32, -bound, bound)

    out = general_attention(x, weight, bias)
    out = jax.block_until_ready(out)

    ref = general_attention_ref(x, weight, bias)
    assert out.shape == (B, S, H)
    # Tolerance covers the approx-EUP reciprocal (+ Newton step) and the
    # deferred-normalization reordering; still well inside f32 fidelity.
    assert jnp.allclose(out, ref, atol=1e-4, rtol=1e-4), "mismatch vs reference"

    print("KERNEL_OK")
</pallas_src>

<mosaic_0001>
module attributes {stable_mosaic.version = 11 : i64} {
  func.func @_general_attention_kernel(%arg0: i32, %arg1: memref<1x8x32xf32, #tpu.memory_space<vmem>>, %arg2: memref<32x32xf32, #tpu.memory_space<vmem>>, %arg3: memref<1x32xf32, #tpu.memory_space<vmem>>, %arg4: memref<1x8x32xf32, #tpu.memory_space<vmem>>) attributes {dimension_semantics = [#tpu.dimension_semantics<parallel>], iteration_bounds = array<i64: 2>, scalar_prefetch = 0 : i64, scratch_operands = 0 : i64, tpu.core_type = #tpu.core_type<tc>, window_params = [{transform_indices = @transform_0, window_bounds = array<i64: 1, 8, 32>}, {pipeline_mode = #tpu.pipeline_mode<synchronous>, transform_indices = @transform_1, window_bounds = array<i64: 32, 32>}, {pipeline_mode = #tpu.pipeline_mode<synchronous>, transform_indices = @transform_2, window_bounds = array<i64: 1, 32>}, {transform_indices = @transform_3, window_bounds = array<i64: 1, 8, 32>}]} {
    %c0 = arith.constant 0 : index
    %c0_0 = arith.constant 0 : index
    %c0_1 = arith.constant 0 : index
    %0 = vector.load %arg1[%c0, %c0_0, %c0_1] : memref<1x8x32xf32, #tpu.memory_space<vmem>>, vector<1x8x32xf32>
    %1 = vector.shape_cast %0 : vector<1x8x32xf32> to vector<8x32xf32>
    %c0_2 = arith.constant 0 : index
    %c0_3 = arith.constant 0 : index
    %2 = vector.load %arg2[%c0_2, %c0_3] : memref<32x32xf32, #tpu.memory_space<vmem>>, vector<32x32xf32>
    %cst = arith.constant dense<0.000000e+00> : vector<8x32xf32>
    %3 = tpu.matmul %1, %2, %cst {dimension_numbers = #tpu.dot_dimension_numbers<[1], [0], [0], [1], [0, 0, 1, 1], [], []>} : vector<8x32xf32>, vector<32x32xf32>, vector<8x32xf32> -> vector<8x32xf32>
    %c0_4 = arith.constant 0 : index
    %c0_5 = arith.constant 0 : index
    %4 = vector.load %arg3[%c0_4, %c0_5] : memref<1x32xf32, #tpu.memory_space<vmem>>, vector<1x32xf32>
    %5 = vector.broadcast %4 : vector<1x32xf32> to vector<8x32xf32>
    %6 = arith.addf %3, %5 : vector<8x32xf32>
    %7 = vector.shape_cast %6 : vector<8x32xf32> to vector<1x8x32xf32>
    "tpu.trace_start"() <{level = 10 : i32, message = "bih,bjh->bij"}> : () -> ()
    %cst_6 = arith.constant dense<0.000000e+00> : vector<1x8x8xf32>
    %8 = tpu.matmul %7, %0, %cst_6 {dimension_numbers = #tpu.dot_dimension_numbers<[2], [2], [1], [1], [0, 0, 0, 1, 1, 1], [0], [0]>} : vector<1x8x32xf32>, vector<1x8x32xf32>, vector<1x8x8xf32> -> vector<1x8x8xf32>
    "tpu.trace_stop"() : () -> ()
    %9 = tpu.iota {dimensions = array<i32: 1>} : vector<1x8x8xi32>
    %10 = tpu.iota {dimensions = array<i32: 2>} : vector<1x8x8xi32>
    %11 = arith.cmpi slt, %10, %9 : vector<1x8x8xi32>
    %cst_7 = arith.constant 0xFF800000 : f32
    %12 = vector.broadcast %cst_7 : f32 to vector<1x8x8xf32>
    %13 = arith.select %11, %8, %12 : vector<1x8x8xi1>, vector<1x8x8xf32>
    %14 = math.exp %13 : vector<1x8x8xf32>
    %cst_8 = arith.constant dense<0.000000e+00> : vector<1x8xf32>
    %15 = vector.multi_reduction <add>, %14, %cst_8 [2] : vector<1x8x8xf32> to vector<1x8xf32>
    %16 = vector.shape_cast %15 : vector<1x8xf32> to vector<1x8x1xf32>
    %cst_9 = arith.constant 1.000000e-10 : f32
    %17 = vector.broadcast %cst_9 : f32 to vector<1x8x1xf32>
    %18 = arith.addf %16, %17 : vector<1x8x1xf32>
    %19 = tpu.reciprocal %18 {approx = true} : vector<1x8x1xf32> -> vector<1x8x1xf32>
    %20 = arith.mulf %18, %19 : vector<1x8x1xf32>
    %cst_10 = arith.constant 2.000000e+00 : f32
    %21 = vector.broadcast %cst_10 : f32 to vector<1x8x1xf32>
    %22 = arith.subf %21, %20 : vector<1x8x1xf32>
    %23 = arith.mulf %19, %22 : vector<1x8x1xf32>
    "tpu.trace_start"() <{level = 10 : i32, message = "bij,bjh->bih"}> : () -> ()
    %cst_11 = arith.constant dense<0.000000e+00> : vector<1x8x32xf32>
    %24 = tpu.matmul %14, %0, %cst_11 {dimension_numbers = #tpu.dot_dimension_numbers<[2], [1], [1], [2], [0, 0, 0, 1, 1, 2], [0], [0]>} : vector<1x8x8xf32>, vector<1x8x32xf32>, vector<1x8x32xf32> -> vector<1x8x32xf32>
    "tpu.trace_stop"() : () -> ()
    %25 = vector.broadcast %23 : vector<1x8x1xf32> to vector<1x8x32xf32>
    %26 = arith.mulf %24, %25 : vector<1x8x32xf32>
    %c0_12 = arith.constant 0 : index
    %c0_13 = arith.constant 0 : index
    %c0_14 = arith.constant 0 : index
    %27 = vector.load %arg4[%c0_12, %c0_13, %c0_14] : memref<1x8x32xf32, #tpu.memory_space<vmem>>, vector<1x8x32xf32>
    tpu.vector_store %arg4[%c0_12, %c0_13, %c0_14], %26 {strides = array<i32>} : memref<1x8x32xf32, #tpu.memory_space<vmem>>, vector<1x8x32xf32>,
    return
  }
  func.func @transform_0(%arg0: i32) -> (i32, i32, i32) {
    %c0_i32 = arith.constant 0 : i32
    %c0_i32_0 = arith.constant 0 : i32
    %c0_i32_1 = arith.constant 0 : i32
    return %arg0, %c0_i32, %c0_i32_0 : i32, i32, i32
  }
  func.func @transform_1(%arg0: i32) -> (i32, i32) {
    %c0_i32 = arith.constant 0 : i32
    %c0_i32_0 = arith.constant 0 : i32
    %c0_i32_1 = arith.constant 0 : i32
    return %c0_i32, %c0_i32_0 : i32, i32
  }
  func.func @transform_2(%arg0: i32) -> (i32, i32) {
    %c0_i32 = arith.constant 0 : i32
    %c0_i32_0 = arith.constant 0 : i32
    %c0_i32_1 = arith.constant 0 : i32
    return %c0_i32, %c0_i32_0 : i32, i32
  }
  func.func @transform_3(%arg0: i32) -> (i32, i32, i32) {
    %c0_i32 = arith.constant 0 : i32
    %c0_i32_0 = arith.constant 0 : i32
    %c0_i32_1 = arith.constant 0 : i32
    return %arg0, %c0_i32, %c0_i32_0 : i32, i32, i32
  }
}

</mosaic_0001>

<bundles_post_ra>
// kernel: tpu_custom_call.1
= control target key start
LH: loop header
LB: loop body
LE: loop exit
PB: predicated region body
PF: predicated region fallthrough
CT: control target
= control target key end

     0   :  { %8 = vsyncpa [#allocation3], 0  ;;  %s1035_s0 = inlined_call_operand.hbm [shape: f32[2,8,32], index: 0, kind: input, shape index: {}]   ;;  %s1036_s1 = inlined_call_operand.hbm [shape: f32[32,32], index: 1, kind: input, shape index: {}]   ;;  %s1037_s2 = inlined_call_operand.vmem [shape: f32[1,32], index: 2, kind: input, shape index: {}]   ;;  %s1038_s3 = inlined_call_operand.hbm [shape: f32[2,8,32], index: 3, kind: output, shape index: {}]  }
   0x1   :  { %10 = vsyncpa [#allocation3 + $0x1], 0 }
   0x2   :  { %11 = vsyncpa [#allocation6], 0 }
   0x3   :  { %12 = vsyncpa [#allocation4], 0 }
   0x4   :  { %14 = vsyncpa [#allocation4 + $0x1], 0  ;;  %s825_s12 = smov 0   ;;  %s827_s13 = smov 0  }
   0x5   :  { %s829_s14 = smov 0   ;;  %s831_s15 = smov 0  }
   0x6 LB: > { %s846_s16 = sadd.s32 4294967295, %s795_s15   ;;  %s546_s17 = sadd.s32 4294967294, %s795_s15   ;;  %s795_s15 = sphi %s831_s15, %s1058_s15   ;;  %s791_s14 = sphi %s829_s14, %s1057_s14   ;;  %s787_s13 = sphi %s827_s13, %s1056_s13   ;;  %s783_s12 = sphi %s825_s12, %s1055_s12  }
   0x7   : > { %p40_p0 = scmp.ne.s32.totalorder %s787_s13, %s783_s12  ;;  %p1039_p1 = scmp.eq.s32.totalorder %s846_s16, 0 }
   0x8   : > { %p112_p3 = scmp.eq.s32.totalorder %s546_s17, 1  ;;  %p547_p5 = scmp.ge.s32.totalorder %s795_s15, 1 }
   0x9   : > { %p855_p4 = por %p1039_p1, %p40_p0  ;;  %p119_p7 = scmp.lt.s32.totalorder %s795_s15, 3 }
   0xa   : > { %p860_p6 = por %p112_p3, %p40_p0  ;;  %s797_s21 = smov [#allocation5]  }
   0xb   : > { %s1042_s18 = scalar_select %p855_p4, 1, 0 }
   0xc   : > { %s1043_s19 = scalar_select %p860_p6, 1, 0 }
   0xd   : > { %p865_p8 = pnand %p547_p5, %p119_p7  ;;  %s131_s22 = sshll.u32 %s797_s21, 4  ;;  %s869_s22 = int_to_ptr.vmem [resolvable:$true] %s131_s22 }
   0xe   : > { %s881_s24 = sadd.s32 1, %s795_s15   ;;  %s27_s25 = sadd.s32 1, %s791_s14 }
   0xf   : > { %s1044_s20 = scalar_select %p865_p8, 1, 0 }
  0x10   : > { %p609_p9 = pneg %p865_p8  ;;  %s24_s26 = ssub.s32 %s795_s15, %s881_s24 }
  0x11   : > { %s667_s29 = scalar_lea.hbm %s1036_s1, 512 }
  0x12   : > { %p876_p11 = pnand %p609_p9, %p1039_p1  ;;  %p668_p12 = scmp.ne.s32.totalorder %s1036_s1, %s667_s29 }
  0x13   : > { %p674_p5 = scmp.lt.u32.totalorder %s667_s29, %s1036_s1 }
  0x14   : > { %p669_p13 = pneg %p876_p11 }
  0x16   : > { %p670_p0 = pnand %p669_p13, %p668_p12 }
  0x18   : > { %p671_p3 = pneg %p670_p0 }
  0x1a   : > { %p676_p7 = pnand %p674_p5, %p671_p3 }
  0x1c   : > { %679 = shalt.err (!%p676_p7)
}
  0x1d   : > { %s680_s7 = scalar_lea.vmem %s869_s22, 512  ;;  %p688_p2 = scmp.lt.s32.totalorder %s869_s22, %s869_s22 }
  0x1e   : > { %p681_p9 = scmp.ne.s32.totalorder %s869_s22, %s680_s7  ;;  %p689_p6 = scmp.lt.s32.totalorder %s680_s7, %s680_s7 }
  0x20   : > { %p683_p10 = pnand %p681_p9, %p669_p13  ;;  %p690_p4 = por %p689_p6, %p688_p2 }
  0x22   : > { %p684_p1 = pneg %p683_p10 }
  0x24   : > { %p691_p8 = pnand %p690_p4, %p684_p1 }
  0x26   : > { %694 = shalt.err (!%p691_p8)
}
  0x27   : > { %s798_s8 = smov 128   ;;  %s799_s9 = smov 8  }
  0x28   : > { %612 = dma.hbm_to_vmem [thread:$0]  (!%p876_p11), %s1036_s1, 512, %s869_s22, [#allocation6], %s798_s8, %s798_s8, %s799_s9  }
  0x29   : > { %p25_p2 = scmp.eq.s32.totalorder %s24_s26, 0  ;;  %p34_p1 = scmp.ne.s32.totalorder %s791_s14, %s787_s13 }
  0x2a   : > { %p35_p4 = scmp.eq.s32.totalorder %s795_s15, 0  ;;  %p622_p6 = scmp.lt.s32.totalorder %s795_s15, 2 }
  0x2b   : > { %s912_s17 = scalar_select %p25_p2, %s791_s14, %s27_s25  }
  0x2c   : > { %p36_p8 = por %p35_p4, %p34_p1  ;;  %p1046_p10 = scmp.eq.s32.totalorder %s846_s16, 1 }
  0x2d   : > { %s148_s27 = sand.u32 1, %s791_s14   ;;  %s551_s28 = sshll.u32 %s795_s15, 7 }
  0x2e   : > { %p916_p12 = por %p1046_p10, %p34_p1  ;;  %s550_s29 = sshll.u32 %s148_s27, 3 }
  0x2f   : > { %s925_s4 = scalar_lea.hbm %s1035_s0, %s551_s28  ;;  %s152_s22 = scalar_lea.vmem [#allocation2], %s550_s29 }
  0x30   : > { %s159_s25 = sshll.u32 %s152_s22, 4  ;;  %p927_p11 = pnand %p622_p6, %p36_p8  ;;  %s931_s25 = int_to_ptr.vmem [resolvable:$true] %s159_s25 }
  0x31   : > { %s149_s5 = scalar_lea.sflag [#allocation3], %s148_s27  ;;  %s695_s6 = scalar_lea.hbm %s925_s4, 128 }
  0x32   : > { %p696_p13 = scmp.ne.s32.totalorder %s925_s4, %s695_s6  ;;  %p697_p0 = pneg %p927_p11 }
  0x33   : > { %s700_s9 = scalar_lea.hbm %s1035_s0, 256  ;;  %p701_p7 = scmp.lt.u32.totalorder %s925_s4, %s1035_s0 }
  0x34   : > { %p698_p3 = pnand %p697_p0, %p696_p13  ;;  %p702_p9 = scmp.lt.u32.totalorder %s700_s9, %s695_s6 }
  0x35   : > { %p704_p1 = scmp.lt.u32.totalorder %s695_s6, %s925_s4 }
  0x36   : > { %p699_p5 = pneg %p698_p3  ;;  %p703_p2 = por %p702_p9, %p701_p7 }
  0x38   : > { %p705_p4 = por %p704_p1, %p703_p2 }
  0x3a   : > { %p706_p6 = pnand %p705_p4, %p699_p5 }
  0x3c   : > { %709 = shalt.err (!%p706_p6)
}
  0x3d   : > { %s710_s27 = scalar_lea.vmem %s931_s25, 128  ;;  %s800_s28 = smov [#allocation2]  }
  0x3e   : > { %p711_p8 = scmp.ne.s32.totalorder %s931_s25, %s710_s27  ;;  %s715_s29 = sshll.u32 %s800_s28, 4  ;;  %s716_s29 = int_to_ptr.vmem [resolvable:$false] %s715_s29 }
  0x3f   : > { %s717_s23 = scalar_lea.vmem %s716_s29, 256  ;;  %p718_p3 = scmp.lt.s32.totalorder %s931_s25, %s716_s29 }
  0x40   : > { %p713_p10 = pnand %p711_p8, %p697_p0  ;;  %p719_p7 = scmp.lt.s32.totalorder %s717_s23, %s710_s27 }
  0x42   : > { %p714_p13 = pneg %p713_p10  ;;  %p720_p9 = por %p719_p7, %p718_p3 }
  0x44   : > { %p721_p2 = pnand %p720_p9, %p714_p13 }
  0x46   : > { %724 = shalt.err (!%p721_p2)
}
  0x47   : > { %616 = dma.hbm_to_vmem [thread:$0]  (!%p927_p11), %s925_s4, 128, %s931_s25, %s149_s5  }
  0x48   : > { %p1049_p5 = scmp.ne.s32.totalorder %s1044_s20, 0 }
  0x49   : > { %s961_s30 = sand.u32 (!%p1049_p5), 1, %s787_s13   ;;  %p1050_p0 = scmp.ne.s32.totalorder (!%p1049_p5), %s1042_s18, 0 }
  0x4a   : > { %168 = sbr.rel (%p1049_p5) target bundleno = 763 (0x2fb), region = 32  ;;  %s553_s22 = sshll.u32 (!%p1049_p5), %s961_s30, 3 }
  0x4b   : > { %s171_s6 = scalar_lea.sflag (!%p1049_p5), [#allocation3], %s961_s30  ;;  %s174_s7 = scalar_lea.vmem (!%p1049_p5), [#allocation2], %s553_s22 }
  0x51   : > { %770 = dma.done.wait (%p1050_p0), %s171_s6, 128  }
  0x52   : > { %772 = vsyncadd (%p1050_p0), %s171_s6, 4294967168  ;;  %p1051_p11 = scmp.eq.s32.totalorder %s846_s16, 0 }
  0x54   : > { %774 = dma.done.wait (%p1051_p11), [#allocation6], 512   ;;  %p1052_p1 = pmov %p1051_p11 }
  0x55   : > { %v801_v0 = vmov 0.0|0.0   ;;  %vm802_vm0 = vmmov 0   ;;  %v803_v1 = vmov 0.0   ;;  %v202_v2 = vld [vmem:[#allocation5] sm:$0xff]  ;;  %v203_v3 = vld [vmem:[#allocation5 + $0x8] sm:$0xff]  ;;  %v204_v4 = vld [vmem:[#allocation5 + $0x10] sm:$0xff]  ;;  %v360_v13 = vlaneseq }
  0x56   : > { %776 = vsyncadd (%p1052_p1), [#allocation6], 4294966784  ;;  %595 = vmatprep.subr.bf16.mxu0 %v801_v0  ;;  %582 = vmatprep.mubr.msk.f32.mxu0 %vm802_vm0, %v803_v1  ;;  %v596_v5 = vpack.c.bf16 %v203_v3, %v202_v2  ;;  %v205_v6 = vld [vmem:[#allocation5 + $0x18] sm:$0xff]  ;;  %vm213_vm1 = vcmask 261120   ;;  %v556_v9 = vld [vmem:[%s1037_s2] ss:$0 sm:$0xff] }
  0x57   : > { %585 = vmatprep.subr.mxu1 %v803_v1  ;;  %587 = vmatprep.mubr.msk.f32.mxu1 %vm802_vm0, %v803_v1  ;;  %v201_v7 = vld [vmem:[%s174_s7] sm:$0xff]  ;;  %v599_v8 = vpack.c.bf16 %v205_v6, %v204_v4  ;;  %v361_v14 = vshrl.u32 %v360_v13, 7  ;;  %v363_v15 = vand.u32 127, %v360_v13  ;;  %vm368_vm3 = vcmask 64512   ;;  %s562_s4 = sshll.u32 %s846_s16, 7  ;;  %s200_s25 = scalar_lea.vmem [#allocation7], %s553_s22 }
  0x58   : > { %586 = vmatpush3.xpose.msk.msra.mxu1 %vm213_vm1, %v201_v7  ;;  %597 = vmatpush3.bf16.msra.mxu0 %v596_v5  ;;  %s466_s26 = sshll.u32 %s200_s25, 4  ;;  %s990_s9 = scalar_lea.hbm %s1038_s3, %s562_s4  ;;  %s992_s26 = int_to_ptr.vmem [resolvable:$true] %s466_s26 }
  0x59   : > { %590 = vmatprep.subr.mxu1 %v803_v1  ;;  %598 = vmatprep.subr.bf16.mxu0 %v801_v0  ;;  %vm364_vm2 = vcmp.lt.s32.totalorder %v363_v15, %v361_v14  ;;  %s453_s16 = scalar_lea.sflag [#allocation4], %s961_s30  ;;  %s725_s10 = scalar_lea.vmem %s992_s26, 128 }
  0x5a   : > { %p726_p4 = scmp.ne.s32.totalorder %s992_s26, %s725_s10  ;;  %s804_s11 = smov [#allocation7]  }
  0x5b   : > { %s729_s27 = sshll.u32 %s804_s11, 4  ;;  %s730_s27 = int_to_ptr.vmem [resolvable:$false] %s729_s27 }
  0x5c   : > { %600 = vmatpush3.bf16.msra.mxu0 %v599_v8  ;;  %p727_p6 = pnand %p726_p4, %p916_p12  ;;  %s731_s28 = scalar_lea.vmem %s730_s27, 256 }
  0x5d   : > { %p732_p10 = scmp.lt.s32.totalorder %s992_s26, %s730_s27  ;;  %p733_p13 = scmp.lt.s32.totalorder %s731_s28, %s725_s10 }
  0x5e   : > { %p728_p8 = pneg %p727_p6 }
  0x5f   : > { %583 = vmatmul.mubr.msk.f32.vlgmr.msra.gmra.mrb[0].mxu0 %vm213_vm1, %v201_v7  ;;  %p734_p3 = por %p733_p13, %p732_p10 }
  0x61   : > { %p735_p7 = pnand %p734_p3, %p728_p8 }
 0x132   : > { %v283_v10 = vpop.f32.mrb[0].mxu0 }
 0x133   : > { %v284_v11 = vadd.f32 %v556_v9, %v283_v10  ;;  %v584_v12 = vpop.f32.mrb[1].mxu0 }
 0x135   : > { %588 = vmatmul.mubr.msk.f32.vlgmr.msra.gmra.mrb[0].mxu1 %vm213_vm1, %v284_v11 }
 0x136   : > { %591 = vmatpush3.msra.mxu1 %v201_v7  ;;  %592 = vmatprep.mubr.msk.f32.mxu1 %vm802_vm0, %v803_v1 }
 0x208   : > { %v356_v16 = vpop.f32.mrb[0].mxu1 }
 0x209   : > { %v365_v17 = vsel %vm364_vm2, %v356_v16, -inf  ;;  %v589_v18 = vpop.f32.mrb[1].mxu1 }
 0x20a   : > { %v366_v19 = vmul.f32 1.442695, %v365_v17 }
 0x20c   : > { %663 = vpow2.f32 %v366_v19 }
 0x216   : > { %v664_v20 = vpop.eup %663 }
 0x217   : > { %593 = vmatmul.mubr.msk.f32.vlgmr.msra.gmra.mrb[2].mxu1 %vm368_vm3, %v664_v20  ;;  %v369_v21 = vsel %vm368_vm3, %v664_v20, 0.0 }
 0x218   : > { %370 = vadd.xlane.f32.xlu0 %v369_v21 }
 0x2a5   : > { %v371_v22 = vpop.xlane.xlu0 %370 }
 0x2a6   : > { %v372_v23 = vadd.f32 1e-10, %v371_v22 }
 0x2a8   : > { %665 = vrcp.f32 %v372_v23 }
 0x2b2   : > { %v666_v24 = vpop.eup %665 }
 0x2b3   : > { %v374_v25 = vmul.f32 %v666_v24, %v372_v23 }
 0x2b5   : > { %v375_v26 = vsub.f32 2.0, %v374_v25 }
 0x2b7   : > { %v376_v27 = vmul.f32 %v666_v24, %v375_v26 }
 0x2ea   : > { %v446_v28 = vpop.f32.mrb[2].mxu1 }
 0x2eb   : > { %v450_v29 = vmul.f32 %v446_v28, %v376_v27  ;;  %v594_v30 = vpop.f32.mrb[3].mxu1 }
 0x2ed   : > { %451 = vst.msk [vmem:[%s200_s25] sm:$0xff] %vm213_vm1, %v450_v29 }
 0x2ee   : > { %738 = shalt.err (!%p735_p7)
}
 0x2ef   : > { %s739_s29 = scalar_lea.hbm %s990_s9, 128  ;;  %s743_s22 = scalar_lea.hbm %s1038_s3, 256 }
 0x2f0   : > { %p740_p9 = scmp.ne.s32.totalorder %s990_s9, %s739_s29  ;;  %p744_p0 = scmp.lt.u32.totalorder %s990_s9, %s1038_s3 }
 0x2f1   : > { %p745_p11 = scmp.lt.u32.totalorder %s743_s22, %s739_s29  ;;  %p747_p4 = scmp.lt.u32.totalorder %s739_s29, %s990_s9 }
 0x2f2   : > { %p741_p2 = pnand %p740_p9, %p916_p12 }
 0x2f3   : > { %p746_p1 = por %p745_p11, %p744_p0 }
 0x2f4   : > { %p742_p5 = pneg %p741_p2 }
 0x2f5   : > { %p748_p6 = por %p747_p4, %p746_p1 }
 0x2f7   : > { %p749_p8 = pnand %p748_p6, %p742_p5 }
 0x2f9   : > { %752 = shalt.err (!%p749_p8)
}
 0x2fa   : > { %607 = dma.vmem_to_hbm [thread:$0]  (%p916_p12), %s992_s26, 128, %s990_s9, %s453_s16  }
 0x2fb PF: > { %s478_s18 = sand.u32 1, %s783_s12   ;;  %p1053_p10 = scmp.ne.s32.totalorder %s1043_s19, 0 }
 0x2fc   : > { %p1054_p13 = scmp.ge.s32.totalorder %s795_s15, 2  ;;  %s479_s20 = scalar_lea.sflag [#allocation4], %s478_s18 }
 0x2fe   : > { %p618_p3 = pnand %p1054_p13, %p1053_p10 }
 0x300   : > { %778 = dma.done.wait (!%p618_p3), %s479_s20, 128  }
 0x301   : > { %780 = vsyncadd (!%p618_p3), %s479_s20, 4294967168  ;;  %p17_p7 = scmp.ge.s32.totalorder %s881_s24, 4   ;;  %s1055_s12 = smov %s787_s13 }
 0x302   : > { %s1056_s13 = smov %s791_s14  ;;  %s1057_s14 = smov %s912_s17 }
 0x303   : > { %s1058_s15 = smov %s881_s24  ;;  %19 = sbr.rel (!%p17_p7) target bundleno = 6 (0x6), region = 81 }
 0x30a   :  { %484 = vsyncpa [#allocation3], 1 }
 0x30b   :  { %486 = vsyncpa [#allocation3 + $0x1], 1 }
 0x30c   :  { %487 = vsyncpa [#allocation6], 1 }
 0x30d   :  { %488 = vsyncpa [#allocation4], 1 }
 0x30e   :  { %490 = vsyncpa [#allocation4 + $0x1], 1 }

</bundles_post_ra>
